<compile_context>
chip_gen: v7x
topology: tpu7x:2x2x1
jax: 0.10.0
libtpu: 0.0.40
codegen_flags: <defaults>
</compile_context>

<pallas_src>
import functools

import jax
import jax.numpy as jnp
from jax.experimental import pallas as pl
from jax.experimental.pallas import tpu as pltpu


def _local_mlp_kernel(x_ref, g_ref, w2c_ref, b2c_ref, w3s_ref, l2e_ref, out_ref,
                      *, H1, NO, SEG, fold):
    tm = x_ref.shape[0]
    Ep = g_ref.shape[0]           # expert count padded up to a multiple of 8

    vals = x_ref[:, 0:1]                                 # (tm, 1) f32
    idx = x_ref[:, 1:2].astype(jnp.int32)                # (tm, 1) i32, trunc toward 0

    # Per-row one-hot over (padded) experts; idx outside [0, E) -> all-zero output.
    e_iota = jax.lax.broadcasted_iota(jnp.int32, (tm, Ep), 1)
    onehot = (e_iota == idx).astype(jnp.float32)         # (tm, Ep)

    # Fused gather: one matmul fetches W1[idx], B1[idx], B3[idx].
    # Segments start at 128-lane boundaries -> result slices are whole-vreg picks.
    g_row = jnp.dot(onehot, g_ref[...], preferred_element_type=jnp.float32)
    w1_row = g_row[:, 0:H1]                              # (tm, H1)
    b1_row = g_row[:, SEG:SEG + H1]                      # (tm, H1)
    b3_row = g_row[:, 2 * SEG:2 * SEG + NO]              # (tm, NO)

    # Layer 1 (input dim 1): per-row scale + shift + ReLU (VPU).
    h1 = jnp.maximum(vals * w1_row + b1_row, 0.0)        # (tm, H1)

    # Layer 2: all experts at once along the lane dim (N = E*H2 fills the MXU).
    h2 = jnp.dot(h1, w2c_ref[...], preferred_element_type=jnp.float32)
    h2 = jnp.maximum(h2 + b2c_ref[...], 0.0)             # (tm, E*H2)

    # Keep only the selected expert's H2 block (precomputed lane->expert map).
    h2 = jnp.where(l2e_ref[...] == idx, h2, 0.0)         # (tm, E*H2)

    # Layer 3: vertically stacked per-expert weights; zeroed blocks contribute 0.
    y = jnp.dot(h2, w3s_ref[...], preferred_element_type=jnp.float32) + b3_row
    y = y.astype(out_ref.dtype)                          # (tm, NO)

    # Lane-dense output: fold `fold` contiguous row-groups into the lane dim.
    # out_block[r, j*NO + c] = y[j*(tm//fold) + r, c]   (unfolded in the wrapper)
    tmf = tm // fold
    for j in range(fold):
        out_ref[:, j * NO:(j + 1) * NO] = y[j * tmf:(j + 1) * tmf, :]


def local_embedding_cat_pallas(x, params, *, tm=1024):
    """x: (N, 2) float32. Returns (N, n_o) float32."""
    W1, B1, W2T, B2, W3T, B3 = params
    E, H1 = W1.shape
    _, _, H2 = W2T.shape
    _, _, NO = W3T.shape
    N = x.shape[0]
    assert tm % 8 == 0

    # Output lane-fold factor (16 when NO=8); degrade gracefully if shapes disallow it.
    fold = 128 // NO if 128 % NO == 0 else 1
    while fold > 1 and tm % (8 * fold) != 0:
        fold //= 2

    # Pad the row count up to a multiple of the row tile.
    n_pad = pl.cdiv(N, tm) * tm
    x32 = x.astype(jnp.float32)
    if n_pad != N:
        x32 = jnp.pad(x32, ((0, n_pad - N), (0, 0)))     # padded rows: val=0, idx=0

    # ---- Pack weights once in the wrapper (all become VMEM-resident constants) ----
    Ep = ((E + 7) // 8) * 8                              # pad expert axis to sublanes
    SEG = ((max(H1, NO) + 127) // 128) * 128             # 128-lane aligned segments
    G = jnp.zeros((Ep, 3 * SEG), jnp.float32)            # [W1 | B1 | B3] gather table
    G = G.at[:E, 0:H1].set(W1)
    G = G.at[:E, SEG:SEG + H1].set(B1)
    G = G.at[:E, 2 * SEG:2 * SEG + NO].set(B3)

    #   W2cat[h, e*H2 + k] = W2T[e, h, k]   -> (H1, E*H2) dense-over-experts RHS
    #   W3stk[e*H2 + k, j] = W3T[e, k, j]   -> (E*H2, NO) vertically stacked RHS
    W2cat = jnp.transpose(W2T, (1, 0, 2)).reshape(H1, E * H2)
    B2cat = B2.reshape(1, E * H2)
    W3stk = W3T.reshape(E * H2, NO)
    lane2e = (jnp.arange(E * H2, dtype=jnp.int32) // H2).reshape(1, E * H2)

    grid = (n_pad // tm,)
    kernel = functools.partial(_local_mlp_kernel, H1=H1, NO=NO, SEG=SEG, fold=fold)

    out_fold = pl.pallas_call(
        kernel,
        out_shape=jax.ShapeDtypeStruct((n_pad // fold, fold * NO), jnp.float32),
        grid_spec=pltpu.PrefetchScalarGridSpec(
            num_scalar_prefetch=0,
            grid=grid,
            in_specs=[
                pl.BlockSpec((tm, 2), lambda i: (i, 0)),            # x rows (val, idx)
                # Weights: full-extent blocks, constant index maps -> fetched once.
                pl.BlockSpec((Ep, 3 * SEG), lambda i: (0, 0)),      # [W1|B1|B3] table
                pl.BlockSpec((H1, E * H2), lambda i: (0, 0)),       # W2cat
                pl.BlockSpec((1, E * H2), lambda i: (0, 0)),        # B2cat
                pl.BlockSpec((E * H2, NO), lambda i: (0, 0)),       # W3stk
                pl.BlockSpec((1, E * H2), lambda i: (0, 0)),        # lane -> expert id
            ],
            out_specs=pl.BlockSpec((tm // fold, fold * NO), lambda i: (i, 0)),
        ),
        compiler_params=pltpu.CompilerParams(
            dimension_semantics=("parallel",),
            vmem_limit_bytes=48 * 1024 * 1024),
    )(x32, G, W2cat, B2cat, W3stk, lane2e)

    # Unfold the lane-dense result back to (n_pad, NO), then drop padding rows.
    nt = n_pad // tm
    tmf = tm // fold
    out = out_fold.reshape(nt, tmf, fold, NO).transpose(0, 2, 1, 3).reshape(n_pad, NO)
    return out[:N]


def make_params(key, num_element, n_h, n_o):
    """Deterministic synthetic parameters (not a checkpoint load)."""
    assert len(n_h) == 2, "kernel is specialized to two hidden layers: n_h=[H1, H2]"
    H1, H2 = n_h
    ks = jax.random.split(key, 6)
    W1 = jax.random.normal(ks[0], (num_element, H1), jnp.float32) * 0.5   # Linear(1,H1).weight squeezed
    B1 = jax.random.normal(ks[1], (num_element, H1), jnp.float32) * 0.1
    W2T = jax.random.normal(ks[2], (num_element, H1, H2), jnp.float32) * (1.0 / jnp.sqrt(H1))
    B2 = jax.random.normal(ks[3], (num_element, H2), jnp.float32) * 0.1
    W3T = jax.random.normal(ks[4], (num_element, H2, n_o), jnp.float32) * (1.0 / jnp.sqrt(H2))
    B3 = jax.random.normal(ks[5], (num_element, n_o), jnp.float32) * 0.1
    return (W1, B1, W2T, B2, W3T, B3)


def reference_jax(x, params):
    W1, B1, W2T, B2, W3T, B3 = params
    vals = x[:, 0:1].astype(jnp.float32)
    idx = x[:, 1].astype(jnp.int32)            # truncation toward zero, like int()
    h = jnp.maximum(vals * W1[idx] + B1[idx], 0.0)
    h = jnp.maximum(jnp.einsum('nh,nhk->nk', h, W2T[idx],
                               precision=jax.lax.Precision.HIGHEST) + B2[idx], 0.0)
    return jnp.einsum('nh,nhk->nk', h, W3T[idx],
                      precision=jax.lax.Precision.HIGHEST) + B3[idx]


if __name__ == "__main__":
    key = jax.random.PRNGKey(0)
    # Small shapes consistent with the module; N is NOT a multiple of the tile so the
    # padding path is exercised.
    N, num_element, n_h, n_o = 300, 4, [32, 32], 8

    kp, kv, ki = jax.random.split(key, 3)
    params = make_params(kp, num_element, n_h, n_o)

    vals = jax.random.normal(kv, (N, 1), jnp.float32)
    idx = jax.random.randint(ki, (N, 1), 0, num_element).astype(jnp.float32)
    x = jnp.concatenate([vals, idx], axis=1)   # (N, 2) — same interface as the PyTorch module

    ref = reference_jax(x, params)

    # 1) Small tile: multi-block grid (3 steps) + row padding + per-block output fold.
    out_small = jax.block_until_ready(local_embedding_cat_pallas(x, params, tm=128))
    assert out_small.shape == (N, n_o)
    assert jnp.allclose(out_small, ref, atol=2e-4, rtol=2e-4)

    # 2) Production default tile (per the perf review): TM=1024, single block here.
    out_big = jax.block_until_ready(local_embedding_cat_pallas(x, params))
    assert out_big.shape == (N, n_o)
    assert jnp.allclose(out_big, ref, atol=2e-4, rtol=2e-4)

    print("KERNEL_OK")
</pallas_src>

<mosaic_0001>
module attributes {stable_mosaic.version = 11 : i64} {
  func.func @_local_mlp_kernel(%arg0: i32, %arg1: memref<128x2xf32, #tpu.memory_space<vmem>>, %arg2: memref<8x384xf32, #tpu.memory_space<vmem>>, %arg3: memref<32x128xf32, #tpu.memory_space<vmem>>, %arg4: memref<1x128xf32, #tpu.memory_space<vmem>>, %arg5: memref<128x8xf32, #tpu.memory_space<vmem>>, %arg6: memref<1x128xi32, #tpu.memory_space<vmem>>, %arg7: memref<8x128xf32, #tpu.memory_space<vmem>>) attributes {dimension_semantics = [#tpu.dimension_semantics<parallel>], iteration_bounds = array<i64: 3>, scalar_prefetch = 0 : i64, scratch_operands = 0 : i64, tpu.core_type = #tpu.core_type<tc>, window_params = [{transform_indices = @transform_0, window_bounds = array<i64: 128, 2>}, {pipeline_mode = #tpu.pipeline_mode<synchronous>, transform_indices = @transform_1, window_bounds = array<i64: 8, 384>}, {pipeline_mode = #tpu.pipeline_mode<synchronous>, transform_indices = @transform_2, window_bounds = array<i64: 32, 128>}, {pipeline_mode = #tpu.pipeline_mode<synchronous>, transform_indices = @transform_3, window_bounds = array<i64: 1, 128>}, {pipeline_mode = #tpu.pipeline_mode<synchronous>, transform_indices = @transform_4, window_bounds = array<i64: 128, 8>}, {pipeline_mode = #tpu.pipeline_mode<synchronous>, transform_indices = @transform_5, window_bounds = array<i64: 1, 128>}, {transform_indices = @transform_6, window_bounds = array<i64: 8, 128>}]} {
    %c0 = arith.constant 0 : index
    %c0_0 = arith.constant 0 : index
    %0 = vector.load %arg1[%c0, %c0_0] : memref<128x2xf32, #tpu.memory_space<vmem>>, vector<128x1xf32>
    %c0_1 = arith.constant 0 : index
    %c1 = arith.constant 1 : index
    %1 = vector.load %arg1[%c0_1, %c1] : memref<128x2xf32, #tpu.memory_space<vmem>>, vector<128x1xf32>
    %2 = arith.fptosi %1 : vector<128x1xf32> to vector<128x1xi32>
    %3 = tpu.iota {dimensions = array<i32: 1>} : vector<128x8xi32>
    %4 = vector.broadcast %2 : vector<128x1xi32> to vector<128x8xi32>
    %5 = arith.cmpi eq, %3, %4 : vector<128x8xi32>
    %6 = arith.extui %5 : vector<128x8xi1> to vector<128x8xi32>
    %7 = arith.sitofp %6 : vector<128x8xi32> to vector<128x8xf32>
    %c0_2 = arith.constant 0 : index
    %c0_3 = arith.constant 0 : index
    %8 = vector.load %arg2[%c0_2, %c0_3] : memref<8x384xf32, #tpu.memory_space<vmem>>, vector<8x384xf32>
    %cst = arith.constant dense<0.000000e+00> : vector<128x384xf32>
    %9 = tpu.matmul %7, %8, %cst {dimension_numbers = #tpu.dot_dimension_numbers<[1], [0], [0], [1], [0, 0, 1, 1], [], []>} : vector<128x8xf32>, vector<8x384xf32>, vector<128x384xf32> -> vector<128x384xf32>
    %10 = vector.extract_strided_slice %9 {offsets = [0, 0], sizes = [128, 32], strides = [1, 1]} : vector<128x384xf32> to vector<128x32xf32>
    %11 = vector.extract_strided_slice %9 {offsets = [0, 128], sizes = [128, 32], strides = [1, 1]} : vector<128x384xf32> to vector<128x32xf32>
    %12 = vector.extract_strided_slice %9 {offsets = [0, 256], sizes = [128, 8], strides = [1, 1]} : vector<128x384xf32> to vector<128x8xf32>
    %13 = vector.broadcast %0 : vector<128x1xf32> to vector<128x32xf32>
    %14 = arith.mulf %13, %10 : vector<128x32xf32>
    %15 = arith.addf %14, %11 : vector<128x32xf32>
    %cst_4 = arith.constant 0.000000e+00 : f32
    %16 = vector.broadcast %cst_4 : f32 to vector<128x32xf32>
    %17 = arith.maximumf %15, %16 : vector<128x32xf32>
    %c0_5 = arith.constant 0 : index
    %c0_6 = arith.constant 0 : index
    %18 = vector.load %arg3[%c0_5, %c0_6] : memref<32x128xf32, #tpu.memory_space<vmem>>, vector<32x128xf32>
    %cst_7 = arith.constant dense<0.000000e+00> : vector<128x128xf32>
    %19 = tpu.matmul %17, %18, %cst_7 {dimension_numbers = #tpu.dot_dimension_numbers<[1], [0], [0], [1], [0, 0, 1, 1], [], []>} : vector<128x32xf32>, vector<32x128xf32>, vector<128x128xf32> -> vector<128x128xf32>
    %c0_8 = arith.constant 0 : index
    %c0_9 = arith.constant 0 : index
    %20 = vector.load %arg4[%c0_8, %c0_9] : memref<1x128xf32, #tpu.memory_space<vmem>>, vector<1x128xf32>
    %21 = vector.broadcast %20 : vector<1x128xf32> to vector<128x128xf32>
    %22 = arith.addf %19, %21 : vector<128x128xf32>
    %cst_10 = arith.constant 0.000000e+00 : f32
    %23 = vector.broadcast %cst_10 : f32 to vector<128x128xf32>
    %24 = arith.maximumf %22, %23 : vector<128x128xf32>
    %c0_11 = arith.constant 0 : index
    %c0_12 = arith.constant 0 : index
    %25 = vector.load %arg6[%c0_11, %c0_12] : memref<1x128xi32, #tpu.memory_space<vmem>>, vector<1x128xi32>
    %26 = vector.broadcast %25 : vector<1x128xi32> to vector<128x128xi32>
    %27 = vector.broadcast %2 : vector<128x1xi32> to vector<128x128xi32>
    %28 = arith.cmpi eq, %26, %27 : vector<128x128xi32>
    %cst_13 = arith.constant 0.000000e+00 : f32
    %29 = vector.broadcast %cst_13 : f32 to vector<128x128xf32>
    %30 = arith.select %28, %24, %29 : vector<128x128xi1>, vector<128x128xf32>
    %c0_14 = arith.constant 0 : index
    %c0_15 = arith.constant 0 : index
    %31 = vector.load %arg5[%c0_14, %c0_15] : memref<128x8xf32, #tpu.memory_space<vmem>>, vector<128x8xf32>
    %cst_16 = arith.constant dense<0.000000e+00> : vector<128x8xf32>
    %32 = tpu.matmul %30, %31, %cst_16 {dimension_numbers = #tpu.dot_dimension_numbers<[1], [0], [0], [1], [0, 0, 1, 1], [], []>} : vector<128x128xf32>, vector<128x8xf32>, vector<128x8xf32> -> vector<128x8xf32>
    %33 = arith.addf %32, %12 : vector<128x8xf32>
    %34 = vector.extract_strided_slice %33 {offsets = [0, 0], sizes = [8, 8], strides = [1, 1]} : vector<128x8xf32> to vector<8x8xf32>
    %c0_17 = arith.constant 0 : index
    %c0_18 = arith.constant 0 : index
    %35 = vector.load %arg7[%c0_17, %c0_18] : memref<8x128xf32, #tpu.memory_space<vmem>>, vector<8x8xf32>
    tpu.vector_store %arg7[%c0_17, %c0_18], %34 {strides = array<i32>} : memref<8x128xf32, #tpu.memory_space<vmem>>, vector<8x8xf32>,
    %36 = vector.extract_strided_slice %33 {offsets = [8, 0], sizes = [8, 8], strides = [1, 1]} : vector<128x8xf32> to vector<8x8xf32>
    %c0_19 = arith.constant 0 : index
    %c8 = arith.constant 8 : index
    %37 = vector.load %arg7[%c0_19, %c8] : memref<8x128xf32, #tpu.memory_space<vmem>>, vector<8x8xf32>
    tpu.vector_store %arg7[%c0_19, %c8], %36 {strides = array<i32>} : memref<8x128xf32, #tpu.memory_space<vmem>>, vector<8x8xf32>,
    %38 = vector.extract_strided_slice %33 {offsets = [16, 0], sizes = [8, 8], strides = [1, 1]} : vector<128x8xf32> to vector<8x8xf32>
    %c0_20 = arith.constant 0 : index
    %c16 = arith.constant 16 : index
    %39 = vector.load %arg7[%c0_20, %c16] : memref<8x128xf32, #tpu.memory_space<vmem>>, vector<8x8xf32>
    tpu.vector_store %arg7[%c0_20, %c16], %38 {strides = array<i32>} : memref<8x128xf32, #tpu.memory_space<vmem>>, vector<8x8xf32>,
    %40 = vector.extract_strided_slice %33 {offsets = [24, 0], sizes = [8, 8], strides = [1, 1]} : vector<128x8xf32> to vector<8x8xf32>
    %c0_21 = arith.constant 0 : index
    %c24 = arith.constant 24 : index
    %41 = vector.load %arg7[%c0_21, %c24] : memref<8x128xf32, #tpu.memory_space<vmem>>, vector<8x8xf32>
    tpu.vector_store %arg7[%c0_21, %c24], %40 {strides = array<i32>} : memref<8x128xf32, #tpu.memory_space<vmem>>, vector<8x8xf32>,
    %42 = vector.extract_strided_slice %33 {offsets = [32, 0], sizes = [8, 8], strides = [1, 1]} : vector<128x8xf32> to vector<8x8xf32>
    %c0_22 = arith.constant 0 : index
    %c32 = arith.constant 32 : index
    %43 = vector.load %arg7[%c0_22, %c32] : memref<8x128xf32, #tpu.memory_space<vmem>>, vector<8x8xf32>
    tpu.vector_store %arg7[%c0_22, %c32], %42 {strides = array<i32>} : memref<8x128xf32, #tpu.memory_space<vmem>>, vector<8x8xf32>,
    %44 = vector.extract_strided_slice %33 {offsets = [40, 0], sizes = [8, 8], strides = [1, 1]} : vector<128x8xf32> to vector<8x8xf32>
    %c0_23 = arith.constant 0 : index
    %c40 = arith.constant 40 : index
    %45 = vector.load %arg7[%c0_23, %c40] : memref<8x128xf32, #tpu.memory_space<vmem>>, vector<8x8xf32>
    tpu.vector_store %arg7[%c0_23, %c40], %44 {strides = array<i32>} : memref<8x128xf32, #tpu.memory_space<vmem>>, vector<8x8xf32>,
    %46 = vector.extract_strided_slice %33 {offsets = [48, 0], sizes = [8, 8], strides = [1, 1]} : vector<128x8xf32> to vector<8x8xf32>
    %c0_24 = arith.constant 0 : index
    %c48 = arith.constant 48 : index
    %47 = vector.load %arg7[%c0_24, %c48] : memref<8x128xf32, #tpu.memory_space<vmem>>, vector<8x8xf32>
    tpu.vector_store %arg7[%c0_24, %c48], %46 {strides = array<i32>} : memref<8x128xf32, #tpu.memory_space<vmem>>, vector<8x8xf32>,
    %48 = vector.extract_strided_slice %33 {offsets = [56, 0], sizes = [8, 8], strides = [1, 1]} : vector<128x8xf32> to vector<8x8xf32>
    %c0_25 = arith.constant 0 : index
    %c56 = arith.constant 56 : index
    %49 = vector.load %arg7[%c0_25, %c56] : memref<8x128xf32, #tpu.memory_space<vmem>>, vector<8x8xf32>
    tpu.vector_store %arg7[%c0_25, %c56], %48 {strides = array<i32>} : memref<8x128xf32, #tpu.memory_space<vmem>>, vector<8x8xf32>,
    %50 = vector.extract_strided_slice %33 {offsets = [64, 0], sizes = [8, 8], strides = [1, 1]} : vector<128x8xf32> to vector<8x8xf32>
    %c0_26 = arith.constant 0 : index
    %c64 = arith.constant 64 : index
    %51 = vector.load %arg7[%c0_26, %c64] : memref<8x128xf32, #tpu.memory_space<vmem>>, vector<8x8xf32>
    tpu.vector_store %arg7[%c0_26, %c64], %50 {strides = array<i32>} : memref<8x128xf32, #tpu.memory_space<vmem>>, vector<8x8xf32>,
    %52 = vector.extract_strided_slice %33 {offsets = [72, 0], sizes = [8, 8], strides = [1, 1]} : vector<128x8xf32> to vector<8x8xf32>
    %c0_27 = arith.constant 0 : index
    %c72 = arith.constant 72 : index
    %53 = vector.load %arg7[%c0_27, %c72] : memref<8x128xf32, #tpu.memory_space<vmem>>, vector<8x8xf32>
    tpu.vector_store %arg7[%c0_27, %c72], %52 {strides = array<i32>} : memref<8x128xf32, #tpu.memory_space<vmem>>, vector<8x8xf32>,
    %54 = vector.extract_strided_slice %33 {offsets = [80, 0], sizes = [8, 8], strides = [1, 1]} : vector<128x8xf32> to vector<8x8xf32>
    %c0_28 = arith.constant 0 : index
    %c80 = arith.constant 80 : index
    %55 = vector.load %arg7[%c0_28, %c80] : memref<8x128xf32, #tpu.memory_space<vmem>>, vector<8x8xf32>
    tpu.vector_store %arg7[%c0_28, %c80], %54 {strides = array<i32>} : memref<8x128xf32, #tpu.memory_space<vmem>>, vector<8x8xf32>,
    %56 = vector.extract_strided_slice %33 {offsets = [88, 0], sizes = [8, 8], strides = [1, 1]} : vector<128x8xf32> to vector<8x8xf32>
    %c0_29 = arith.constant 0 : index
    %c88 = arith.constant 88 : index
    %57 = vector.load %arg7[%c0_29, %c88] : memref<8x128xf32, #tpu.memory_space<vmem>>, vector<8x8xf32>
    tpu.vector_store %arg7[%c0_29, %c88], %56 {strides = array<i32>} : memref<8x128xf32, #tpu.memory_space<vmem>>, vector<8x8xf32>,
    %58 = vector.extract_strided_slice %33 {offsets = [96, 0], sizes = [8, 8], strides = [1, 1]} : vector<128x8xf32> to vector<8x8xf32>
    %c0_30 = arith.constant 0 : index
    %c96 = arith.constant 96 : index
    %59 = vector.load %arg7[%c0_30, %c96] : memref<8x128xf32, #tpu.memory_space<vmem>>, vector<8x8xf32>
    tpu.vector_store %arg7[%c0_30, %c96], %58 {strides = array<i32>} : memref<8x128xf32, #tpu.memory_space<vmem>>, vector<8x8xf32>,
    %60 = vector.extract_strided_slice %33 {offsets = [104, 0], sizes = [8, 8], strides = [1, 1]} : vector<128x8xf32> to vector<8x8xf32>
    %c0_31 = arith.constant 0 : index
    %c104 = arith.constant 104 : index
    %61 = vector.load %arg7[%c0_31, %c104] : memref<8x128xf32, #tpu.memory_space<vmem>>, vector<8x8xf32>
    tpu.vector_store %arg7[%c0_31, %c104], %60 {strides = array<i32>} : memref<8x128xf32, #tpu.memory_space<vmem>>, vector<8x8xf32>,
    %62 = vector.extract_strided_slice %33 {offsets = [112, 0], sizes = [8, 8], strides = [1, 1]} : vector<128x8xf32> to vector<8x8xf32>
    %c0_32 = arith.constant 0 : index
    %c112 = arith.constant 112 : index
    %63 = vector.load %arg7[%c0_32, %c112] : memref<8x128xf32, #tpu.memory_space<vmem>>, vector<8x8xf32>
    tpu.vector_store %arg7[%c0_32, %c112], %62 {strides = array<i32>} : memref<8x128xf32, #tpu.memory_space<vmem>>, vector<8x8xf32>,
    %64 = vector.extract_strided_slice %33 {offsets = [120, 0], sizes = [8, 8], strides = [1, 1]} : vector<128x8xf32> to vector<8x8xf32>
    %c0_33 = arith.constant 0 : index
    %c120 = arith.constant 120 : index
    %65 = vector.load %arg7[%c0_33, %c120] : memref<8x128xf32, #tpu.memory_space<vmem>>, vector<8x8xf32>
    tpu.vector_store %arg7[%c0_33, %c120], %64 {strides = array<i32>} : memref<8x128xf32, #tpu.memory_space<vmem>>, vector<8x8xf32>,
    return
  }
  func.func @transform_0(%arg0: i32) -> (i32, i32) {
    %c0_i32 = arith.constant 0 : i32
    %c0_i32_0 = arith.constant 0 : i32
    return %arg0, %c0_i32 : i32, i32
  }
  func.func @transform_1(%arg0: i32) -> (i32, i32) {
    %c0_i32 = arith.constant 0 : i32
    %c0_i32_0 = arith.constant 0 : i32
    %c0_i32_1 = arith.constant 0 : i32
    return %c0_i32, %c0_i32_0 : i32, i32
  }
  func.func @transform_2(%arg0: i32) -> (i32, i32) {
    %c0_i32 = arith.constant 0 : i32
    %c0_i32_0 = arith.constant 0 : i32
    %c0_i32_1 = arith.constant 0 : i32
    return %c0_i32, %c0_i32_0 : i32, i32
  }
  func.func @transform_3(%arg0: i32) -> (i32, i32) {
    %c0_i32 = arith.constant 0 : i32
    %c0_i32_0 = arith.constant 0 : i32
    %c0_i32_1 = arith.constant 0 : i32
    return %c0_i32, %c0_i32_0 : i32, i32
  }
  func.func @transform_4(%arg0: i32) -> (i32, i32) {
    %c0_i32 = arith.constant 0 : i32
    %c0_i32_0 = arith.constant 0 : i32
    %c0_i32_1 = arith.constant 0 : i32
    return %c0_i32, %c0_i32_0 : i32, i32
  }
  func.func @transform_5(%arg0: i32) -> (i32, i32) {
    %c0_i32 = arith.constant 0 : i32
    %c0_i32_0 = arith.constant 0 : i32
    %c0_i32_1 = arith.constant 0 : i32
    return %c0_i32, %c0_i32_0 : i32, i32
  }
  func.func @transform_6(%arg0: i32) -> (i32, i32) {
    %c0_i32 = arith.constant 0 : i32
    %c0_i32_0 = arith.constant 0 : i32
    return %arg0, %c0_i32 : i32, i32
  }
}

</mosaic_0001>

<bundles_post_ra>
// kernel: tpu_custom_call.1
= control target key start
LH: loop header
LB: loop body
LE: loop exit
PB: predicated region body
PF: predicated region fallthrough
CT: control target
= control target key end

     0   :  { %11 = vsyncpa [#allocation3], 0  ;;  %s2474_s0 = inlined_call_operand.vmem [shape: f32[384,2], index: 0, kind: input, shape index: {}]   ;;  %s2475_s1 = inlined_call_operand.vmem [shape: f32[8,384], index: 1, kind: input, shape index: {}]   ;;  %s2476_s2 = inlined_call_operand.vmem [shape: f32[32,128], index: 2, kind: input, shape index: {}]   ;;  %s2477_s3 = inlined_call_operand.vmem [shape: f32[1,128], index: 3, kind: input, shape index: {}]   ;;  %s2478_s4 = inlined_call_operand.vmem [shape: f32[128,8], index: 4, kind: input, shape index: {}]   ;;  %s2479_s5 = inlined_call_operand.vmem [shape: s32[1,128], index: 5, kind: input, shape index: {}]   ;;  %s2480_s6 = inlined_call_operand.hbm [shape: f32[24,128], index: 6, kind: output, shape index: {}]  }
   0x1   :  { %13 = vsyncpa [#allocation3 + $0x1], 0  ;;  %s1996_s21 = smov 0   ;;  %s1998_s22 = smov 0  }
   0x2   :  { %s2000_s23 = smov 0   ;;  %s2002_s24 = smov 0  }
   0x3 LB: > { %s2017_s25 = sadd.s32 4294967295, %s1940_s24   ;;  %s1451_s26 = sadd.s32 4294967294, %s1940_s24   ;;  %s1940_s24 = sphi %s2002_s24, %s2486_s24   ;;  %s1936_s23 = sphi %s2000_s23, %s2485_s23   ;;  %s1932_s22 = sphi %s1998_s22, %s2484_s22   ;;  %s1928_s21 = sphi %s1996_s21, %s2483_s21  }
   0x4   : > { %s2021_s27 = sadd.s32 1, %s1940_s24   ;;  %s157_s28 = sadd.s32 1, %s1936_s23 }
   0x5   : > { %s154_s29 = ssub.s32 %s1940_s24, %s2021_s27  ;;  %p167_p0 = scmp.ne.s32.totalorder %s1936_s23, %s1932_s22 }
   0x6   : > { %p155_p1 = scmp.eq.s32.totalorder %s154_s29, 0  ;;  %p168_p2 = scmp.eq.s32.totalorder %s2017_s25, 2 }
   0x7   : > { %p173_p3 = scmp.ne.s32.totalorder %s1932_s22, %s1928_s21  ;;  %p174_p4 = scmp.eq.s32.totalorder %s1451_s26, 2 }
   0x8   : > { %s2032_s30 = scalar_select %p155_p1, %s1936_s23, %s157_s28  }
   0x9   : > { %p2034_p5 = por %p168_p2, %p167_p0  ;;  %p2038_p6 = por %p174_p4, %p173_p3 }
   0xa   : > { %p1454_p7 = scmp.ge.s32.totalorder %s1940_s24, 1  ;;  %p216_p8 = scmp.lt.s32.totalorder %s1940_s24, 4 }
   0xc   : > { %p217_p9 = pnand %p1454_p7, %p216_p8 }
   0xd   : > { %s1456_s9 = sshll.u32 (!%p217_p9), %s2017_s25, 4  ;;  %v1942_v0 = vmov (!%p217_p9), 1   ;;  %v1943_v1 = vmov (!%p217_p9), 0.0   ;;  %v383_v18 = vld [vmem:[%s2475_s1 + $0x8] sm:$0xff] (!%p217_p9)  ;;  %v382_v19 = vld [vmem:[%s2475_s1] sm:$0xff] (!%p217_p9)  ;;  %v384_v44 = vld [vmem:[%s2475_s1 + $0x10] sm:$0xff] (!%p217_p9)  ;;  %v284_v54 = vlaneseq (!%p217_p9) }
   0xe   : > { %220 = sbr.rel (%p217_p9) target bundleno = 998 (0x3e6), region = 44  ;;  %1875 = vset.pattern.permute.xlu1 (!%p217_p9), %v1942_v0  ;;  %1874 = vset.pattern.permute.xlu0 (!%p217_p9), %v1942_v0  ;;  %p247_p10 = scmp.lt.s32.totalorder (!%p217_p9), %s1456_s9, 47  ;;  %v1944_v53 = vmov (!%p217_p9), 0   ;;  %vm385_vm0 = vcmask (!%p217_p9), 64512  }
   0xf   : > { %498 = vmatprep.mubr.f32.mxu0 (!%p217_p9), %v1943_v1  ;;  %434 = vmatprep.subr.mxu0 (!%p217_p9), %v383_v18  ;;  %v2100_v55 = vand.u32 (!%p217_p9), 127, %v284_v54  ;;  %s243_s19 = sand.u32 (!%p217_p9), 1, %s1932_s22   ;;  %s1945_s26 = smov (!%p217_p9), 8  }
  0x10   : > { %435 = vmatpush1.msra.mxu0 (!%p217_p9), %v382_v19  ;;  %1767 = vmatprep.subr.mxu1 (!%p217_p9), %v384_v44  ;;  %s1455_s20 = sshll.u32 (!%p217_p9), %s243_s19, 3  ;;  %s1946_s29 = smov (!%p217_p9), 24  }
  0x11   : > { %1613 = vmatprep.subr.mxu0 (!%p217_p9), %v384_v44  ;;  %1768 = vmatpush3.msra.mxu1 (!%p217_p9), %v384_v44  ;;  %s2400_s28 = scalar_lea.vmem (!%p217_p9), [#allocation2], %s1455_s20  ;;  %s1949_s11 = smov (!%p217_p9), 32  }
  0x12   : > { %s1950_s12 = smov (!%p217_p9), 56   ;;  %s1952_s14 = smov (!%p217_p9), 72  }
  0x13   : > { %s1953_s15 = smov (!%p217_p9), 64   ;;  %s1954_s16 = smov (!%p217_p9), 88  }
  0x14   : > { %s1955_s17 = smov (!%p217_p9), 80   ;;  %s1956_s18 = smov (!%p217_p9), 104  }
  0x15   : > { %s2488_s9 = smov (!%p247_p10, %s1456_s9), 47  ;;  %s1957_s20 = smov 96  }
  0x16   : > { %s1457_s10 = sshll.u32 %s2488_s9, 3  ;;  %s1947_s9 = smov 16  }
  0x17   : > { %s2049_s13 = scalar_lea.vmem %s2474_s0, %s1457_s10  ;;  %s1948_s10 = smov 40  }
  0x18   : > { %v2052_v2 = vld [vmem:[%s2049_s13 + $0x10] sm:$0xff]  ;;  %v2055_v3 = vld [vmem:[%s2049_s13] sm:$0xff]  ;;  %v2058_v4 = vld [vmem:[%s2049_s13 + $0x18] sm:$0xff] }
  0x19   : > { %v1789_v5 = vtrunc.f32 %v2052_v2  ;;  %v1785_v6 = vtrunc.f32 %v2055_v3  ;;  %v1791_v7 = vtrunc.f32 %v2058_v4  ;;  %v2064_v8 = vld [vmem:[%s2049_s13 + $0x8] sm:$0xff]  ;;  %v2071_v11 = vld [vmem:[%s2049_s13 + $0x20] sm:$0xff]  ;;  %v259_v20 = vld [vmem:[%s2049_s13 + $0x38] sm:$0xff] }
  0x1a   : > { %v1787_v9 = vtrunc.f32 %v2064_v8  ;;  %v2068_v10 = vld [vmem:[%s2049_s13 + $0x28] sm:$0xff]  ;;  %v1793_v17 = vtrunc.f32 %v2071_v11  ;;  %v258_v21 = vld [vmem:[%s2049_s13 + $0x30] sm:$0xff]  ;;  %v1799_v24 = vtrunc.f32 %v259_v20  ;;  %v260_v27 = vld [vmem:[%s2049_s13 + $0x40] sm:$0xff] }
  0x1b   : > { %v1790_v12 = vcvt.f32.s32 %v1789_v5  ;;  %v1786_v13 = vcvt.f32.s32 %v1785_v6  ;;  %v1792_v14 = vcvt.f32.s32 %v1791_v7  ;;  %v1795_v16 = vtrunc.f32 %v2068_v10  ;;  %v261_v26 = vld [vmem:[%s2049_s13 + $0x48] sm:$0xff]  ;;  %v263_v32 = vld [vmem:[%s2049_s13 + $0x58] sm:$0xff]  ;;  %v262_v33 = vld [vmem:[%s2049_s13 + $0x50] sm:$0xff] }
  0x1c   : > { %v1788_v15 = vcvt.f32.s32 %v1787_v9  ;;  %v1794_v23 = vcvt.f32.s32 %v1793_v17  ;;  %v1797_v25 = vtrunc.f32 %v258_v21  ;;  %v1800_v28 = vcvt.f32.s32 %v1799_v24  ;;  %v265_v38 = vld [vmem:[%s2049_s13 + $0x68] sm:$0xff]  ;;  %v264_v39 = vld [vmem:[%s2049_s13 + $0x60] sm:$0xff]  ;;  %v267_v45 = vld [vmem:[%s2049_s13 + $0x78] sm:$0xff] }
  0x1d   : > { %293 = vperm.xlu1 %1875, %v1790_v12   ;;  %287 = vperm.xlu0 %1874, %v1786_v13   ;;  %v1796_v22 = vcvt.f32.s32 %v1795_v16  ;;  %v1803_v30 = vtrunc.f32 %v261_v26  ;;  %v1801_v31 = vtrunc.f32 %v260_v27  ;;  %v1807_v36 = vtrunc.f32 %v263_v32  ;;  %v266_v46 = vld [vmem:[%s2049_s13 + $0x70] sm:$0xff]  ;;  %s1951_s13 = smov 48  }
  0x1e   : > { %v1798_v29 = vcvt.f32.s32 %v1797_v25  ;;  %v1805_v37 = vtrunc.f32 %v262_v33  ;;  %v1811_v42 = vtrunc.f32 %v265_v38  ;;  %v1809_v43 = vtrunc.f32 %v264_v39  ;;  %v869_v25 = vld [vmem:[%s2476_s2 + $0x8] sm:$0xff] }
  0x1f   : > { %v1804_v34 = vcvt.f32.s32 %v1803_v30  ;;  %v1802_v35 = vcvt.f32.s32 %v1801_v31  ;;  %v1808_v40 = vcvt.f32.s32 %v1807_v36  ;;  %v1815_v49 = vtrunc.f32 %v267_v45  ;;  %v1126_v30 = vld [vmem:[%s2478_s4] sm:$0xff]  ;;  %v1127_v31 = vld [vmem:[%s2478_s4 + $0x8] sm:$0xff] }
  0x20   : > { %v1806_v41 = vcvt.f32.s32 %v1805_v37  ;;  %v1812_v47 = vcvt.f32.s32 %v1811_v42  ;;  %v1810_v48 = vcvt.f32.s32 %v1809_v43  ;;  %v1813_v50 = vtrunc.f32 %v266_v46  ;;  %v1128_v43 = vld [vmem:[%s2478_s4 + $0x10] sm:$0xff] }
  0x21   : > { %296 = vperm.xlu1 %1875, %v1792_v14   ;;  %290 = vperm.xlu0 %1874, %v1788_v15   ;;  %v1816_v51 = vcvt.f32.s32 %v1815_v49 }
  0x22   : > { %v1814_v52 = vcvt.f32.s32 %v1813_v50 }
  0x25   : > { %302 = vperm.xlu1 %1875, %v1796_v22   ;;  %299 = vperm.xlu0 %1874, %v1794_v23  }
  0x29   : > { %308 = vperm.xlu1 %1875, %v1800_v28   ;;  %305 = vperm.xlu0 %1874, %v1798_v29   ;;  %v871_v28 = vld [vmem:[%s2476_s2 + $0x18] sm:$0xff] }
  0x2d   : > { %314 = vperm.xlu1 %1875, %v1804_v34   ;;  %311 = vperm.xlu0 %1874, %v1802_v35  }
  0x31   : > { %320 = vperm.xlu1 %1875, %v1808_v40   ;;  %317 = vperm.xlu0 %1874, %v1806_v41  }
  0x35   : > { %326 = vperm.xlu1 %1875, %v1812_v47   ;;  %323 = vperm.xlu0 %1874, %v1810_v48  }
  0x39   : > { %332 = vperm.xlu1 %1875, %v1816_v51   ;;  %329 = vperm.xlu0 %1874, %v1814_v52   ;;  %v1130_v52 = vld [vmem:[%s2478_s4 + $0x20] sm:$0xff] }
  0x3d   : > { %1876 = vset.pattern.permute.xlu0 %v1944_v53  ;;  %1877 = vset.pattern.permute.xlu1 %v1944_v53  ;;  %v1131_v53 = vld [vmem:[%s2478_s4 + $0x28] sm:$0xff] }
  0x3e   : > { %742 = vperm.xlu0 %1876, %v2055_v3   ;;  %747 = vperm.xlu1 %1877, %v2064_v8  }
  0x42   : > { %752 = vperm.xlu1 %1877, %v2052_v2   ;;  %757 = vperm.xlu0 %1876, %v2058_v4  }
  0x46   : > { %762 = vperm.xlu1 %1877, %v2071_v11   ;;  %767 = vperm.xlu0 %1876, %v2068_v10  }
  0x4a   : > { %772 = vperm.xlu1 %1877, %v258_v21   ;;  %777 = vperm.xlu0 %1876, %v259_v20  }
  0x4e   : > { %782 = vperm.xlu1 %1877, %v260_v27   ;;  %787 = vperm.xlu0 %1876, %v261_v26   ;;  %v870_v27 = vld [vmem:[%s2476_s2 + $0x10] sm:$0xff] }
  0x4f   : > { %v1731_v29 = vpack.c.bf16 %v871_v28, %v870_v27 }
  0x52   : > { %792 = vperm.xlu1 %1877, %v262_v33   ;;  %797 = vperm.xlu0 %1876, %v263_v32   ;;  %v1735_v32 = vpack.c.bf16 %v1127_v31, %v1126_v30  ;;  %v1136_v31 = vld [vmem:[%s2478_s4 + $0x50] sm:$0xff] }
  0x56   : > { %802 = vperm.xlu1 %1877, %v264_v39   ;;  %807 = vperm.xlu0 %1876, %v265_v38  }
  0x5a   : > { %812 = vperm.xlu1 %1877, %v266_v46   ;;  %817 = vperm.xlu0 %1876, %v267_v45  }
  0x9c   : > { %v2102_v56 = vpop.permute.xlu1 %293  ;;  %v2104_v57 = vpop.permute.xlu0 %287 }
  0x9d   : > { %vm334_vm1 = vcmp.eq.s32.totalorder %v2100_v55, %v2104_v57  ;;  %vm336_vm2 = vcmp.eq.s32.totalorder %v2100_v55, %v2102_v56 }
  0x9e   : > { %v2109_v58 = vsel %vm334_vm1, 1.0, %v1943_v1  ;;  %v2128_v62 = vsel %vm336_vm2, 1.0, %v1943_v1  ;;  %vm879_vm2 = vcmask 261120  }
  0x9f   : > { %1474 = vmatmul.mubr.msk.f32.vlgmr.msra.gmra.mrb[0].mxu0 %vm385_vm0, %v2109_v58 }
  0xa0   : > { %v2113_v59 = vpop.permute.xlu1 %296  ;;  %v2115_v60 = vpop.permute.xlu0 %290  ;;  %504 = vmatprep.mubr.f32.mxu0 %v1943_v1  ;;  %1614 = vmatpush3.msra.mxu0 %v384_v44  ;;  %v1129_v44 = vld [vmem:[%s2478_s4 + $0x18] sm:$0xff] }
  0xa1   : > { %vm335_vm3 = vcmp.eq.s32.totalorder %v2100_v55, %v2115_v60  ;;  %vm337_vm4 = vcmp.eq.s32.totalorder %v2100_v55, %v2113_v59  ;;  %v1739_v51 = vpack.c.bf16 %v1129_v44, %v1128_v43 }
  0xa2   : > { %v2123_v61 = vsel %vm335_vm3, 1.0, %v1943_v1  ;;  %v2145_v4 = vsel %vm337_vm4, 1.0, %v1943_v1 }
  0xa3   : > { %1475 = vmatmul.mubr.msk.f32.gmra.mrb[2].mxu0 %vm385_vm0, %v2123_v61 }
  0xa4   : > { %v2130_v63 = vpop.permute.xlu1 %302  ;;  %v2132_v0 = vpop.permute.xlu0 %299  ;;  %510 = vmatprep.mubr.f32.mxu0 %v1943_v1 }
  0xa5   : > { %vm338_vm5 = vcmp.eq.s32.totalorder %v2100_v55, %v2132_v0  ;;  %vm339_vm8 = vcmp.eq.s32.totalorder %v2100_v55, %v2130_v63 }
  0xa6   : > { %v1462_v7 = vsel %vm338_vm5, 1.0, %v1943_v1  ;;  %v1463_v12 = vsel %vm339_vm8, 1.0, %v1943_v1 }
  0xa7   : > { %1476 = vmatmul.mubr.msk.f32.gmra.mrb[4].mxu0 %vm385_vm0, %v2128_v62 }
  0xa8   : > { %v2139_v2 = vpop.permute.xlu1 %308  ;;  %v2141_v3 = vpop.permute.xlu0 %305  ;;  %516 = vmatprep.mubr.f32.mxu0 %v1943_v1 }
  0xa9   : > { %vm340_vm11 = vcmp.eq.s32.totalorder %v2100_v55, %v2141_v3  ;;  %vm341_vm14 = vcmp.eq.s32.totalorder %v2100_v55, %v2139_v2 }
  0xaa   : > { %v1464_v17 = vsel %vm340_vm11, 1.0, %v1943_v1  ;;  %v1465_v22 = vsel %vm341_vm14, 1.0, %v1943_v1 }
  0xab   : > { %1477 = vmatmul.mubr.msk.f32.gmra.mrb[6].mxu0 %vm385_vm0, %v2145_v4 }
  0xac   : > { %v2151_v5 = vpop.permute.xlu1 %314  ;;  %v2153_v6 = vpop.permute.xlu0 %311  ;;  %522 = vmatprep.mubr.f32.mxu0 %v1943_v1 }
  0xad   : > { %vm343_vm6 = vcmp.eq.s32.totalorder %v2100_v55, %v2151_v5  ;;  %vm342_vm7 = vcmp.eq.s32.totalorder %v2100_v55, %v2153_v6 }
  0xae   : > { %v1467_v8 = vsel %vm343_vm6, 1.0, %v1943_v1  ;;  %v1466_v9 = vsel %vm342_vm7, 1.0, %v1943_v1 }
  0xaf   : > { %1478 = vmatmul.mubr.msk.f32.gmra.mrb[8].mxu0 %vm385_vm0, %v1462_v7  ;;  %1627 = vmatprep.mubr.msk.f32.mxu1 %vm385_vm0, %v1466_v9 }
  0xb0   : > { %v2167_v10 = vpop.permute.xlu1 %320  ;;  %1628 = vmatmul.mubr.msk.f32.vlgmr.msra.gmra.mrb[0].mxu1 %vm385_vm0, %v1467_v8  ;;  %v2170_v11 = vpop.permute.xlu0 %317  ;;  %528 = vmatprep.mubr.f32.mxu0 %v1943_v1 }
  0xb1   : > { %vm345_vm9 = vcmp.eq.s32.totalorder %v2100_v55, %v2167_v10  ;;  %vm344_vm10 = vcmp.eq.s32.totalorder %v2100_v55, %v2170_v11 }
  0xb2   : > { %v1469_v13 = vsel %vm345_vm9, 1.0, %v1943_v1  ;;  %v1468_v14 = vsel %vm344_vm10, 1.0, %v1943_v1 }
  0xb3   : > { %1479 = vmatmul.mubr.msk.f32.gmra.mrb[10].mxu0 %vm385_vm0, %v1463_v12  ;;  %1630 = vmatprep.mubr.msk.f32.mxu1 %vm385_vm0, %v1468_v14 }
  0xb4   : > { %v2184_v15 = vpop.permute.xlu1 %326  ;;  %1631 = vmatmul.mubr.msk.f32.gmra.mrb[2].mxu1 %vm385_vm0, %v1469_v13  ;;  %v2187_v16 = vpop.permute.xlu0 %323  ;;  %534 = vmatprep.mubr.f32.mxu0 %v1943_v1 }
  0xb5   : > { %vm347_vm12 = vcmp.eq.s32.totalorder %v2100_v55, %v2184_v15  ;;  %vm346_vm13 = vcmp.eq.s32.totalorder %v2100_v55, %v2187_v16 }
  0xb6   : > { %v1471_v18 = vsel %vm347_vm12, 1.0, %v1943_v1  ;;  %v1470_v19 = vsel %vm346_vm13, 1.0, %v1943_v1 }
  0xb7   : > { %1480 = vmatmul.mubr.msk.f32.gmra.mrb[12].mxu0 %vm385_vm0, %v1464_v17  ;;  %1633 = vmatprep.mubr.msk.f32.mxu1 %vm385_vm0, %v1470_v19 }
  0xb8   : > { %v2201_v20 = vpop.permute.xlu1 %332  ;;  %1634 = vmatmul.mubr.msk.f32.gmra.mrb[4].mxu1 %vm385_vm0, %v1471_v18  ;;  %v2204_v21 = vpop.permute.xlu0 %329  ;;  %540 = vmatprep.mubr.f32.mxu0 %v1943_v1 }
  0xb9   : > { %vm349_vm15 = vcmp.eq.s32.totalorder %v2100_v55, %v2201_v20  ;;  %vm348_vm1 = vcmp.eq.s32.totalorder %v2100_v55, %v2204_v21 }
  0xba   : > { %v1473_v23 = vsel %vm349_vm15, 1.0, %v1943_v1  ;;  %v1472_v24 = vsel %vm348_vm1, 1.0, %v1943_v1 }
  0xbb   : > { %1481 = vmatmul.mubr.msk.f32.gmra.mrb[14].mxu0 %vm385_vm0, %v1465_v22  ;;  %1636 = vmatprep.mubr.msk.f32.mxu1 %vm385_vm0, %v1472_v24 }
  0xbc   : > { %1637 = vmatmul.mubr.msk.f32.gmra.mrb[6].mxu1 %vm385_vm0, %v1473_v23  ;;  %546 = vmatprep.mubr.f32.mxu0 %v1943_v1 }
  0xbd   : > { %v743_v33 = vpop.permute.xlu0 %742  ;;  %v748_v37 = vpop.permute.xlu1 %747 }
  0xbf   : > { %1482 = vmatmul.mubr.msk.f32.gmra.mrb[16].mxu0 %vm385_vm0, %v1466_v9  ;;  %v1133_v9 = vld [vmem:[%s2478_s4 + $0x38] sm:$0xff] }
  0xc0   : > { %552 = vmatprep.mubr.f32.mxu0 %v1943_v1 }
  0xc1   : > { %v753_v46 = vpop.permute.xlu1 %752  ;;  %v758_v55 = vpop.permute.xlu0 %757 }
  0xc3   : > { %1483 = vmatmul.mubr.msk.f32.gmra.mrb[18].mxu0 %vm385_vm0, %v1467_v8  ;;  %v1132_v8 = vld [vmem:[%s2478_s4 + $0x30] sm:$0xff] }
  0xc4   : > { %558 = vmatprep.mubr.f32.mxu0 %v1943_v1 }
  0xc7   : > { %1484 = vmatmul.mubr.msk.f32.gmra.mrb[20].mxu0 %vm385_vm0, %v1468_v14 }
  0xc8   : > { %564 = vmatprep.mubr.f32.mxu0 %v1943_v1 }
  0xcb   : > { %1485 = vmatmul.mubr.msk.f32.gmra.mrb[22].mxu0 %vm385_vm0, %v1469_v13  ;;  %v763_v13 = vpop.permute.xlu1 %762 }
  0xcc   : > { %570 = vmatprep.mubr.f32.mxu0 %v1943_v1 }
  0xcf   : > { %1486 = vmatmul.mubr.msk.f32.gmra.mrb[24].mxu0 %vm385_vm0, %v1470_v19 }
  0xd0   : > { %576 = vmatprep.mubr.f32.mxu0 %v1943_v1 }
  0xd3   : > { %1487 = vmatmul.mubr.msk.f32.gmra.mrb[26].mxu0 %vm385_vm0, %v1471_v18 }
  0xd4   : > { %582 = vmatprep.mubr.f32.mxu0 %v1943_v1 }
  0xd7   : > { %1488 = vmatmul.mubr.msk.f32.gmra.mrb[28].mxu0 %vm385_vm0, %v1472_v24  ;;  %v1135_v24 = vld [vmem:[%s2478_s4 + $0x48] sm:$0xff] }
  0xd8   : > { %588 = vmatprep.mubr.f32.mxu0 %v1943_v1  ;;  %v868_v1 = vld [vmem:[%s2476_s2] sm:$0xff] }
  0xd9   : > { %v1727_v26 = vpack.c.bf16 %v869_v25, %v868_v1  ;;  %v768_v25 = vpop.permute.xlu0 %767 }
  0xdb   : > { %1489 = vmatmul.mubr.msk.f32.gmra.mrb[30].mxu0 %vm385_vm0, %v1473_v23  ;;  %1728 = vmatprep.subr.bf16.mxu1 %v1727_v26  ;;  %v1134_v23 = vld [vmem:[%s2478_s4 + $0x40] sm:$0xff] }
  0xdc   : > { %1615 = vmatprep.mubr.msk.f32.mxu0 %vm385_vm0, %v2109_v58  ;;  %1730 = vmatpush3.bf16.msra.mxu1 %v1727_v26  ;;  %v1751_v30 = vpack.c.bf16 %v1135_v24, %v1134_v23 }
  0xdd   : > { %1732 = vmatprep.subr.bf16.mxu1 %v1731_v29  ;;  %v778_v43 = vpop.permute.xlu0 %777 }
  0xdf   : > { %1616 = vmatmul.mubr.msk.f32.vlgmr.msra.gmra.mrb[32].mxu0 %vm385_vm0, %v2123_v61 }
  0xe0   : > { %1618 = vmatprep.mubr.msk.f32.mxu0 %vm385_vm0, %v2128_v62  ;;  %1734 = vmatpush3.bf16.msra.mxu1 %v1731_v29 }
  0xe1   : > { %1736 = vmatprep.subr.bf16.mxu1 %v1735_v32 }
  0xe3   : > { %1619 = vmatmul.mubr.msk.f32.gmra.mrb[34].mxu0 %vm385_vm0, %v2145_v4 }
  0xe4   : > { %1621 = vmatprep.mubr.msk.f32.mxu0 %vm385_vm0, %v1462_v7  ;;  %v1743_v7 = vpack.c.bf16 %v1131_v53, %v1130_v52 }
  0xe7   : > { %1622 = vmatmul.mubr.msk.f32.gmra.mrb[36].mxu0 %vm385_vm0, %v1463_v12 }
  0xe8   : > { %1624 = vmatprep.mubr.msk.f32.mxu0 %vm385_vm0, %v1464_v17 }
  0xeb   : > { %1625 = vmatmul.mubr.msk.f32.gmra.mrb[38].mxu0 %vm385_vm0, %v1465_v22  ;;  %v1747_v22 = vpack.c.bf16 %v1133_v9, %v1132_v8 }
 0x172   : > { %v500_v34 = vpop.f32.mrb[0].mxu0 }
 0x173   : > { %v820_v35 = vmul.f32 %v743_v33, %v500_v34  ;;  %v502_v36 = vpop.f32.mrb[1].mxu0  ;;  %v773_v34 = vpop.permute.xlu1 %772 }
 0x175   : > { %v836_v38 = vadd.f32 %v820_v35, %v502_v36 }
 0x176   : > { %v506_v39 = vpop.f32.mrb[2].mxu0 }
 0x177   : > { %v852_v40 = vmax.f32 %v836_v38, 0.0  ;;  %v821_v41 = vmul.f32 %v748_v37, %v506_v39  ;;  %v508_v42 = vpop.f32.mrb[3].mxu0 }
 0x179   : > { %v837_v45 = vadd.f32 %v821_v41, %v508_v42  ;;  %1647 = vmatprep.mubr.msk.f32.mxu1 %vm879_vm2, %v852_v40  ;;  %v1138_v40 = vld [vmem:[%s2478_s4 + $0x60] sm:$0xff]  ;;  %v1139_v41 = vld [vmem:[%s2478_s4 + $0x68] sm:$0xff] }
 0x17a   : > { %v512_v47 = vpop.f32.mrb[4].mxu0 }
 0x17b   : > { %v853_v48 = vmax.f32 %v837_v45, 0.0  ;;  %v822_v49 = vmul.f32 %v753_v46, %v512_v47  ;;  %v514_v50 = vpop.f32.mrb[5].mxu0 }
 0x17d   : > { %v838_v54 = vadd.f32 %v822_v49, %v514_v50  ;;  %1648 = vmatmul.mubr.msk.f32.vlgmr.msra.gmra.mrb[8].mxu1 %vm879_vm2, %v853_v48  ;;  %v1759_v48 = vpack.c.bf16 %v1139_v41, %v1138_v40  ;;  %v783_v50 = vpop.permute.xlu1 %782 }
 0x17e   : > { %v518_v58 = vpop.f32.mrb[6].mxu0  ;;  %1738 = vmatpush3.bf16.msra.mxu1 %v1735_v32  ;;  %v1137_v32 = vld [vmem:[%s2478_s4 + $0x58] sm:$0xff] }
 0x17f   : > { %v854_v61 = vmax.f32 %v838_v54, 0.0  ;;  %v823_v62 = vmul.f32 %v758_v55, %v518_v58  ;;  %v520_v4 = vpop.f32.mrb[7].mxu0  ;;  %1740 = vmatprep.subr.bf16.mxu1 %v1739_v51  ;;  %v1755_v39 = vpack.c.bf16 %v1137_v32, %v1136_v31  ;;  %v788_v58 = vpop.permute.xlu0 %787 }
 0x181   : > { %v839_v12 = vadd.f32 %v823_v62, %v520_v4  ;;  %1650 = vmatprep.mubr.msk.f32.mxu1 %vm879_vm2, %v854_v61  ;;  %v793_v9 = vpop.permute.xlu1 %792 }
 0x182   : > { %v524_v14 = vpop.f32.mrb[8].mxu0  ;;  %1742 = vmatpush3.bf16.msra.mxu1 %v1739_v51 }
 0x183   : > { %v855_v17 = vmax.f32 %v839_v12, 0.0  ;;  %v824_v18 = vmul.f32 %v763_v13, %v524_v14  ;;  %v526_v19 = vpop.f32.mrb[9].mxu0  ;;  %1744 = vmatprep.subr.bf16.mxu1 %v1743_v7 }
 0x185   : > { %v840_v1 = vadd.f32 %v824_v18, %v526_v19  ;;  %1651 = vmatmul.mubr.msk.f32.gmra.mrb[10].mxu1 %vm879_vm2, %v855_v17  ;;  %v798_v19 = vpop.permute.xlu0 %797 }
 0x186   : > { %v530_v26 = vpop.f32.mrb[10].mxu0  ;;  %1746 = vmatpush3.bf16.msra.mxu1 %v1743_v7 }
 0x187   : > { %v856_v27 = vmax.f32 %v840_v1, 0.0  ;;  %v825_v28 = vmul.f32 %v768_v25, %v530_v26  ;;  %v532_v29 = vpop.f32.mrb[11].mxu0  ;;  %1748 = vmatprep.subr.bf16.mxu1 %v1747_v22  ;;  %v803_v26 = vpop.permute.xlu1 %802 }
 0x189   : > { %v841_v33 = vadd.f32 %v825_v28, %v532_v29  ;;  %1653 = vmatprep.mubr.msk.f32.mxu1 %vm879_vm2, %v856_v27  ;;  %v808_v32 = vpop.permute.xlu0 %807 }
 0x18a   : > { %v536_v35 = vpop.f32.mrb[12].mxu0  ;;  %1750 = vmatpush3.bf16.msra.mxu1 %v1747_v22 }
 0x18b   : > { %v857_v36 = vmax.f32 %v841_v33, 0.0  ;;  %v826_v37 = vmul.f32 %v773_v34, %v536_v35  ;;  %v538_v38 = vpop.f32.mrb[13].mxu0  ;;  %1752 = vmatprep.subr.bf16.mxu1 %v1751_v30 }
 0x18d   : > { %v842_v42 = vadd.f32 %v826_v37, %v538_v38  ;;  %1654 = vmatmul.mubr.msk.f32.gmra.mrb[12].mxu1 %vm879_vm2, %v857_v36  ;;  %v813_v38 = vpop.permute.xlu1 %812 }
 0x18e   : > { %v542_v44 = vpop.f32.mrb[14].mxu0  ;;  %1754 = vmatpush3.bf16.msra.mxu1 %v1751_v30 }
 0x18f   : > { %v858_v45 = vmax.f32 %v842_v42, 0.0  ;;  %v827_v46 = vmul.f32 %v778_v43, %v542_v44  ;;  %v544_v47 = vpop.f32.mrb[15].mxu0  ;;  %1756 = vmatprep.subr.bf16.mxu1 %v1755_v39  ;;  %v818_v44 = vpop.permute.xlu0 %817 }
 0x191   : > { %v843_v49 = vadd.f32 %v827_v46, %v544_v47  ;;  %1656 = vmatprep.mubr.msk.f32.mxu1 %vm879_vm2, %v858_v45 }
 0x192   : > { %v548_v51 = vpop.f32.mrb[16].mxu0  ;;  %1758 = vmatpush3.bf16.msra.mxu1 %v1755_v39 }
 0x193   : > { %v859_v52 = vmax.f32 %v843_v49, 0.0  ;;  %v828_v53 = vmul.f32 %v783_v50, %v548_v51  ;;  %v550_v54 = vpop.f32.mrb[17].mxu0  ;;  %1760 = vmatprep.subr.bf16.mxu1 %v1759_v48 }
 0x195   : > { %v844_v55 = vadd.f32 %v828_v53, %v550_v54  ;;  %1657 = vmatmul.mubr.msk.f32.gmra.mrb[14].mxu1 %vm879_vm2, %v859_v52 }
 0x196   : > { %v554_v61 = vpop.f32.mrb[18].mxu0  ;;  %1762 = vmatpush3.bf16.msra.mxu1 %v1759_v48 }
 0x197   : > { %v860_v62 = vmax.f32 %v844_v55, 0.0  ;;  %v829_v4 = vmul.f32 %v788_v58, %v554_v61  ;;  %v556_v7 = vpop.f32.mrb[19].mxu0 }
 0x199   : > { %v845_v8 = vadd.f32 %v829_v4, %v556_v7  ;;  %1659 = vmatprep.mubr.msk.f32.mxu1 %vm879_vm2, %v860_v62  ;;  %v1140_v4 = vld [vmem:[%s2478_s4 + $0x70] sm:$0xff]  ;;  %v1141_v7 = vld [vmem:[%s2478_s4 + $0x78] sm:$0xff] }
 0x19a   : > { %v560_v12 = vpop.f32.mrb[20].mxu0 }
 0x19b   : > { %v861_v13 = vmax.f32 %v845_v8, 0.0  ;;  %v830_v14 = vmul.f32 %v793_v9, %v560_v12  ;;  %v562_v17 = vpop.f32.mrb[21].mxu0  ;;  %v1763_v8 = vpack.c.bf16 %v1141_v7, %v1140_v4  ;;  %v2340_v9 = vld [vmem:[%s2477_s3] ss:$0 sm:$0xff] }
 0x19d   : > { %v846_v18 = vadd.f32 %v830_v14, %v562_v17  ;;  %1660 = vmatmul.mubr.msk.f32.gmra.mrb[16].mxu1 %vm879_vm2, %v861_v13  ;;  %1764 = vmatprep.subr.bf16.mxu1 %v1763_v8  ;;  %v2346_v17 = vld [vmem:[%s2479_s5] ss:$0 sm:$0xff] }
 0x19e   : > { %v566_v22 = vpop.f32.mrb[22].mxu0  ;;  %1766 = vmatpush3.bf16.msra.mxu1 %v1763_v8  ;;  %vm1094_vm3 = vcmp.eq.s32.totalorder %v2346_v17, %v2104_v57  ;;  %vm1095_vm4 = vcmp.eq.s32.totalorder %v2346_v17, %v2115_v60  ;;  %vm1096_vm5 = vcmp.eq.s32.totalorder %v2346_v17, %v2102_v56  ;;  %vm1097_vm6 = vcmp.eq.s32.totalorder %v2346_v17, %v2113_v59 }
 0x19f   : > { %v862_v23 = vmax.f32 %v846_v18, 0.0  ;;  %v831_v24 = vmul.f32 %v798_v19, %v566_v22  ;;  %v568_v1 = vpop.f32.mrb[23].mxu0  ;;  %vm1098_vm7 = vcmp.eq.s32.totalorder %v2346_v17, %v2132_v0  ;;  %vm1099_vm8 = vcmp.eq.s32.totalorder %v2346_v17, %v2130_v63 }
 0x1a0   : > { %vm1100_vm9 = vcmp.eq.s32.totalorder %v2346_v17, %v2141_v3  ;;  %vm1101_vm10 = vcmp.eq.s32.totalorder %v2346_v17, %v2139_v2  ;;  %vm1102_vm11 = vcmp.eq.s32.totalorder %v2346_v17, %v2153_v6  ;;  %vm1103_vm12 = vcmp.eq.s32.totalorder %v2346_v17, %v2151_v5 }
 0x1a1   : > { %v847_v25 = vadd.f32 %v831_v24, %v568_v1  ;;  %1662 = vmatprep.mubr.msk.f32.mxu1 %vm879_vm2, %v862_v23  ;;  %vm1104_vm13 = vcmp.eq.s32.totalorder %v2346_v17, %v2170_v11  ;;  %vm1105_vm14 = vcmp.eq.s32.totalorder %v2346_v17, %v2167_v10  ;;  %vm1106_vm15 = vcmp.eq.s32.totalorder %v2346_v17, %v2187_v16 }
 0x1a2   : > { %v572_v27 = vpop.f32.mrb[24].mxu0  ;;  %vm1107_vm1 = vcmp.eq.s32.totalorder %v2346_v17, %v2184_v15 }
 0x1a3   : > { %v863_v28 = vmax.f32 %v847_v25, 0.0  ;;  %v832_v29 = vmul.f32 %v803_v26, %v572_v27  ;;  %v574_v30 = vpop.f32.mrb[25].mxu0 }
 0x1a5   : > { %v848_v31 = vadd.f32 %v832_v29, %v574_v30  ;;  %1663 = vmatmul.mubr.msk.f32.gmra.mrb[18].mxu1 %vm879_vm2, %v863_v28 }
 0x1a6   : > { %v578_v33 = vpop.f32.mrb[26].mxu0 }
 0x1a7   : > { %v864_v34 = vmax.f32 %v848_v31, 0.0  ;;  %v833_v35 = vmul.f32 %v808_v32, %v578_v33  ;;  %v580_v36 = vpop.f32.mrb[27].mxu0 }
 0x1a9   : > { %v849_v37 = vadd.f32 %v833_v35, %v580_v36  ;;  %1665 = vmatprep.mubr.msk.f32.mxu1 %vm879_vm2, %v864_v34 }
 0x1aa   : > { %v584_v39 = vpop.f32.mrb[28].mxu0 }
 0x1ab   : > { %v865_v40 = vmax.f32 %v849_v37, 0.0  ;;  %v834_v41 = vmul.f32 %v813_v38, %v584_v39  ;;  %v586_v42 = vpop.f32.mrb[29].mxu0 }
 0x1ad   : > { %v850_v43 = vadd.f32 %v834_v41, %v586_v42  ;;  %1666 = vmatmul.mubr.msk.f32.gmra.mrb[20].mxu1 %vm879_vm2, %v865_v40 }
 0x1ae   : > { %v590_v45 = vpop.f32.mrb[30].mxu0 }
 0x1af   : > { %v866_v46 = vmax.f32 %v850_v43, 0.0  ;;  %v835_v47 = vmul.f32 %v818_v44, %v590_v45  ;;  %v592_v48 = vpop.f32.mrb[31].mxu0 }
 0x1b1   : > { %v851_v49 = vadd.f32 %v835_v47, %v592_v48  ;;  %1668 = vmatprep.mubr.msk.f32.mxu1 %vm879_vm2, %v866_v46 }
 0x1b2   : > { %v2314_v50 = vpop.f32.mrb[32].mxu0 }
 0x1b3   : > { %v867_v51 = vmax.f32 %v851_v49, 0.0  ;;  %v2316_v52 = vpop.f32.mrb[33].mxu0 }
 0x1b5   : > { %1669 = vmatmul.mubr.msk.f32.gmra.mrb[22].mxu1 %vm879_vm2, %v867_v51  ;;  %vm1108_vm2 = vcmp.eq.s32.totalorder %v2346_v17, %v2204_v21 }
 0x1b6   : > { %v2319_v53 = vpop.f32.mrb[34].mxu0 }
 0x1b7   : > { %v2321_v54 = vpop.f32.mrb[35].mxu0 }
 0x1ba   : > { %v2323_v55 = vpop.f32.mrb[36].mxu0 }
 0x1bb   : > { %v2325_v58 = vpop.f32.mrb[37].mxu0 }
 0x1be   : > { %v2327_v61 = vpop.f32.mrb[38].mxu0 }
 0x1bf   : > { %v2329_v62 = vpop.f32.mrb[39].mxu0 }
 0x250   : > { %v1649_v12 = vpop.f32.mrb[8].mxu1 }
 0x251   : > { %v1000_v13 = vadd.f32 %v1649_v12, %v2340_v9  ;;  %v994_v14 = vpop.f32.mrb[9].mxu1 }
 0x252   : > { %v995_v18 = vadd.f32 %v2340_v9, %v994_v14 }
 0x253   : > { %v1074_v22 = vmax.f32 %v1000_v13, 0.0 }
 0x254   : > { %v1073_v19 = vmax.f32 %v995_v18, 0.0 }
 0x256   : > { %1703 = vmatprep.mubr.msk.f32.mxu1 %vm1094_vm3, %v1073_v19  ;;  %vm1109_vm3 = vcmp.eq.s32.totalorder %v2346_v17, %v2201_v20 }
 0x257   : > { %1704 = vmatmul.mubr.msk.f32.vlgmr.msra.gmra.mrb[24].mxu1 %vm1095_vm4, %v1074_v22  ;;  %vm1298_vm4 = vcmask 195712  }
 0x258   : > { %v1652_v23 = vpop.f32.mrb[10].mxu1 }
 0x259   : > { %v1010_v24 = vadd.f32 %v1652_v23, %v2340_v9  ;;  %v1004_v1 = vpop.f32.mrb[11].mxu1 }
 0x25a   : > { %v1005_v25 = vadd.f32 %v2340_v9, %v1004_v1 }
 0x25b   : > { %v1076_v27 = vmax.f32 %v1010_v24, 0.0 }
 0x25c   : > { %v1075_v26 = vmax.f32 %v1005_v25, 0.0 }
 0x25e   : > { %1706 = vmatprep.mubr.msk.f32.mxu1 %vm1096_vm5, %v1075_v26  ;;  %vm1304_vm5 = vcmask 261312  }
 0x25f   : > { %1707 = vmatmul.mubr.msk.f32.gmra.mrb[26].mxu1 %vm1097_vm6, %v1076_v27  ;;  %vm1310_vm6 = vcmask 326912  }
 0x260   : > { %v1655_v57 = vpop.f32.mrb[12].mxu1 }
 0x261   : > { %v1020_v60 = vadd.f32 %v1655_v57, %v2340_v9  ;;  %v1014_v28 = vpop.f32.mrb[13].mxu1 }
 0x262   : > { %v1015_v29 = vadd.f32 %v2340_v9, %v1014_v28 }
 0x263   : > { %v1078_v31 = vmax.f32 %v1020_v60, 0.0 }
 0x264   : > { %v1077_v30 = vmax.f32 %v1015_v29, 0.0 }
 0x266   : > { %1709 = vmatprep.mubr.msk.f32.mxu1 %vm1098_vm7, %v1077_v30  ;;  %vm1316_vm7 = vcmask 392512  }
 0x267   : > { %1710 = vmatmul.mubr.msk.f32.gmra.mrb[28].mxu1 %vm1099_vm8, %v1078_v31  ;;  %vm1322_vm8 = vcmask 458112  }
 0x268   : > { %v1658_v56 = vpop.f32.mrb[14].mxu1 }
 0x269   : > { %v1030_v59 = vadd.f32 %v1658_v56, %v2340_v9  ;;  %v1024_v32 = vpop.f32.mrb[15].mxu1 }
 0x26a   : > { %v1025_v33 = vadd.f32 %v2340_v9, %v1024_v32 }
 0x26b   : > { %v1080_v35 = vmax.f32 %v1030_v59, 0.0 }
 0x26c   : > { %v1079_v34 = vmax.f32 %v1025_v33, 0.0 }
 0x26e   : > { %1712 = vmatprep.mubr.msk.f32.mxu1 %vm1100_vm9, %v1079_v34  ;;  %vm1328_vm9 = vcmask 523712  }
 0x26f   : > { %1713 = vmatmul.mubr.msk.f32.gmra.mrb[30].mxu1 %vm1101_vm10, %v1080_v35  ;;  %vm1334_vm10 = vcmask 589312  }
 0x270   : > { %v1661_v0 = vpop.f32.mrb[16].mxu1 }
 0x271   : > { %v1040_v63 = vadd.f32 %v1661_v0, %v2340_v9  ;;  %v1034_v36 = vpop.f32.mrb[17].mxu1 }
 0x272   : > { %v1035_v37 = vadd.f32 %v2340_v9, %v1034_v36 }
 0x273   : > { %v1082_v39 = vmax.f32 %v1040_v63, 0.0 }
 0x274   : > { %v1081_v38 = vmax.f32 %v1035_v37, 0.0 }
 0x276   : > { %1715 = vmatprep.mubr.msk.f32.mxu1 %vm1102_vm11, %v1081_v38  ;;  %vm1340_vm11 = vcmask 654912  }
 0x277   : > { %1716 = vmatmul.mubr.msk.f32.gmra.mrb[0].mxu1 %vm1103_vm12, %v1082_v39  ;;  %vm1346_vm12 = vcmask 720512  }
 0x278   : > { %v1664_v3 = vpop.f32.mrb[18].mxu1 }
 0x279   : > { %v1050_v2 = vadd.f32 %v1664_v3, %v2340_v9  ;;  %v1044_v40 = vpop.f32.mrb[19].mxu1 }
 0x27a   : > { %v1045_v41 = vadd.f32 %v2340_v9, %v1044_v40 }
 0x27b   : > { %v1084_v43 = vmax.f32 %v1050_v2, 0.0 }
 0x27c   : > { %v1083_v42 = vmax.f32 %v1045_v41, 0.0 }
 0x27e   : > { %1718 = vmatprep.mubr.msk.f32.mxu1 %vm1104_vm13, %v1083_v42  ;;  %vm1352_vm13 = vcmask 786112  }
 0x27f   : > { %1719 = vmatmul.mubr.msk.f32.gmra.mrb[2].mxu1 %vm1105_vm14, %v1084_v43  ;;  %vm1358_vm14 = vcmask 851712  }
 0x280   : > { %v1667_v6 = vpop.f32.mrb[20].mxu1 }
 0x281   : > { %v1060_v5 = vadd.f32 %v1667_v6, %v2340_v9  ;;  %v1054_v44 = vpop.f32.mrb[21].mxu1 }
 0x282   : > { %v1055_v45 = vadd.f32 %v2340_v9, %v1054_v44 }
 0x283   : > { %v1086_v47 = vmax.f32 %v1060_v5, 0.0 }
 0x284   : > { %v1085_v46 = vmax.f32 %v1055_v45, 0.0 }
 0x286   : > { %1721 = vmatprep.mubr.msk.f32.mxu1 %vm1106_vm15, %v1085_v46  ;;  %vm1364_vm15 = vcmask 917312  }
 0x287   : > { %1722 = vmatmul.mubr.msk.f32.gmra.mrb[4].mxu1 %vm1107_vm1, %v1086_v47  ;;  %vm1370_vm1 = vcmask 982912  }
 0x288   : > { %v1670_v10 = vpop.f32.mrb[22].mxu1 }
 0x289   : > { %v1070_v11 = vadd.f32 %v1670_v10, %v2340_v9  ;;  %v1064_v48 = vpop.f32.mrb[23].mxu1 }
 0x28a   : > { %v1065_v49 = vadd.f32 %v2340_v9, %v1064_v48 }
 0x28b   : > { %v1088_v4 = vmax.f32 %v1070_v11, 0.0 }
 0x28c   : > { %v1087_v51 = vmax.f32 %v1065_v49, 0.0 }
 0x28e   : > { %1724 = vmatprep.mubr.msk.f32.mxu1 %vm1108_vm2, %v1087_v51  ;;  %vm1376_vm2 = vcmask 1048512  }
 0x28f   : > { %1725 = vmatmul.mubr.msk.f32.gmra.mrb[6].mxu1 %vm1109_vm3, %v1088_v4 }
 0x32a   : > { %v1705_v15 = vpop.f32.mrb[24].mxu1 }
 0x32b   : > { %v1214_v16 = vadd.f32 %v1705_v15, %v2314_v50  ;;  %v1208_v7 = vpop.f32.mrb[25].mxu1 }
 0x32c   : > { %v1209_v8 = vadd.f32 %v1208_v7, %v2316_v52 }
 0x32d   : > { %1289 = vrot.lane.b32.xlu1 %v1214_v16, %s1945_s26  ;;  %s1958_s26 = smov 120  }
 0x32e   : > { %1287 = vst.msk [vmem:[%s2400_s28] sm:$0xff] %vm385_vm0, %v1209_v8  ;;  %vm1292_vm0 = vcmask 130112  }
 0x332   : > { %v1708_v21 = vpop.f32.mrb[26].mxu1 }
 0x333   : > { %v1224_v20 = vadd.f32 %v1708_v21, %v2319_v53  ;;  %v1218_v9 = vpop.f32.mrb[27].mxu1 }
 0x334   : > { %v1219_v12 = vadd.f32 %v1218_v9, %v2321_v54 }
 0x335   : > { %1301 = vrot.lane.b32.xlu1 %v1224_v20, %s1946_s29  ;;  %s1959_s29 = smov 112  }
 0x336   : > { %1295 = vrot.lane.b32.xlu0 %v1219_v12, %s1947_s9  ;;  %s1541_s9 = sshll.u32 %s2017_s25, 7 }
 0x33a   : > { %v1711_v50 = vpop.f32.mrb[28].mxu1 }
 0x33b   : > { %v1234_v52 = vadd.f32 %v1711_v50, %v2323_v55  ;;  %v1228_v13 = vpop.f32.mrb[29].mxu1 }
 0x33c   : > { %v1229_v14 = vadd.f32 %v1228_v13, %v2325_v58 }
 0x33d   : > { %1313 = vrot.lane.b32.xlu1 %v1234_v52, %s1948_s10  ;;  %s1392_s10 = sshll.u32 %s2400_s28, 4  ;;  %s2430_s10 = int_to_ptr.vmem [resolvable:$true] %s1392_s10 }
 0x33e   : > { %1307 = vrot.lane.b32.xlu0 %v1229_v14, %s1949_s11  ;;  %s1878_s25 = scalar_lea.vmem %s2430_s10, 128 }
 0x33f   : > { %p1879_p11 = scmp.ne.s32.totalorder %s2430_s10, %s1878_s25 }
 0x341   : > { %p1880_p12 = pnand %p1879_p11, %p2034_p5 }
 0x342   : > { %v1714_v17 = vpop.f32.mrb[30].mxu1 }
 0x343   : > { %v1244_v53 = vadd.f32 %v1714_v17, %v2327_v61  ;;  %v1238_v18 = vpop.f32.mrb[31].mxu1  ;;  %p1881_p13 = pneg %p1880_p12 }
 0x344   : > { %v1239_v54 = vadd.f32 %v1238_v18, %v2329_v62 }
 0x345   : > { %1325 = vrot.lane.b32.xlu1 %v1244_v53, %s1950_s12 }
 0x346   : > { %1319 = vrot.lane.b32.xlu0 %v1239_v54, %s1951_s13  ;;  %s2428_s13 = scalar_lea.hbm %s2480_s6, %s1541_s9 }
 0x34a   : > { %v1717_v19 = vpop.f32.mrb[0].mxu1 }
 0x34b   : > { %1337 = vrot.lane.b32.xlu1 %v1717_v19, %s1952_s14  ;;  %v1248_v55 = vpop.f32.mrb[1].mxu1  ;;  %s1379_s14 = scalar_lea.sflag [#allocation3], %s243_s19 }
 0x34c   : > { %1331 = vrot.lane.b32.xlu0 %v1248_v55, %s1953_s15  ;;  %s1960_s15 = smov [#allocation2]  }
 0x352   : > { %v1720_v58 = vpop.f32.mrb[2].mxu1 }
 0x353   : > { %1349 = vrot.lane.b32.xlu1 %v1720_v58, %s1954_s16  ;;  %v1258_v22 = vpop.f32.mrb[3].mxu1  ;;  %s1882_s16 = sshll.u32 %s1960_s15, 4  ;;  %s1883_s16 = int_to_ptr.vmem [resolvable:$false] %s1882_s16 }
 0x354   : > { %1343 = vrot.lane.b32.xlu0 %v1258_v22, %s1955_s17  ;;  %s1884_s17 = scalar_lea.vmem %s1883_s16, 256  ;;  %p1885_p0 = scmp.lt.s32.totalorder %s2430_s10, %s1883_s16 }
 0x355   : > { %p1886_p1 = scmp.lt.s32.totalorder %s1884_s17, %s1878_s25 }
 0x357   : > { %p1887_p2 = por %p1886_p1, %p1885_p0 }
 0x359   : > { %p1888_p3 = pnand %p1887_p2, %p1881_p13 }
 0x35a   : > { %v1723_v61 = vpop.f32.mrb[4].mxu1 }
 0x35b   : > { %1361 = vrot.lane.b32.xlu1 %v1723_v61, %s1956_s18  ;;  %v1268_v62 = vpop.f32.mrb[5].mxu1 }
 0x35c   : > { %1355 = vrot.lane.b32.xlu0 %v1268_v62, %s1957_s20 }
 0x362   : > { %v1726_v23 = vpop.f32.mrb[6].mxu1 }
 0x363   : > { %1373 = vrot.lane.b32.xlu1 %v1726_v23, %s1958_s26  ;;  %v1278_v24 = vpop.f32.mrb[7].mxu1 }
 0x364   : > { %1367 = vrot.lane.b32.xlu0 %v1278_v24, %s1959_s29 }
 0x39f   : > { %v1290_v1 = vpop.permute.xlu1 %1289 }
 0x3a0   : > { %1293 = vst.msk [vmem:[%s2400_s28] sm:$0xff] %vm1292_vm0, %v1290_v1 }
 0x3a7   : > { %v1302_v26 = vpop.permute.xlu1 %1301 }
 0x3a8   : > { %v1296_v25 = vpop.permute.xlu0 %1295 }
 0x3a9   : > { %1299 = vst.msk [vmem:[%s2400_s28] sm:$0xff] %vm1298_vm4, %v1296_v25 }
 0x3aa   : > { %1305 = vst.msk [vmem:[%s2400_s28] sm:$0xff] %vm1304_vm5, %v1302_v26 }
 0x3af   : > { %v1314_v57 = vpop.permute.xlu1 %1313 }
 0x3b0   : > { %v1308_v27 = vpop.permute.xlu0 %1307 }
 0x3b1   : > { %1311 = vst.msk [vmem:[%s2400_s28] sm:$0xff] %vm1310_vm6, %v1308_v27 }
 0x3b2   : > { %1317 = vst.msk [vmem:[%s2400_s28] sm:$0xff] %vm1316_vm7, %v1314_v57 }
 0x3b7   : > { %v1326_v28 = vpop.permute.xlu1 %1325 }
 0x3b8   : > { %v1320_v60 = vpop.permute.xlu0 %1319 }
 0x3b9   : > { %1323 = vst.msk [vmem:[%s2400_s28] sm:$0xff] %vm1322_vm8, %v1320_v60 }
 0x3ba   : > { %1329 = vst.msk [vmem:[%s2400_s28] sm:$0xff] %vm1328_vm9, %v1326_v28 }
 0x3bd   : > { %v1338_v30 = vpop.permute.xlu1 %1337 }
 0x3be   : > { %v1332_v29 = vpop.permute.xlu0 %1331 }
 0x3bf   : > { %1335 = vst.msk [vmem:[%s2400_s28] sm:$0xff] %vm1334_vm10, %v1332_v29 }
 0x3c0   : > { %1341 = vst.msk [vmem:[%s2400_s28] sm:$0xff] %vm1340_vm11, %v1338_v30 }
 0x3c5   : > { %v1350_v56 = vpop.permute.xlu1 %1349 }
 0x3c6   : > { %v1344_v31 = vpop.permute.xlu0 %1343 }
 0x3c7   : > { %1347 = vst.msk [vmem:[%s2400_s28] sm:$0xff] %vm1346_vm12, %v1344_v31 }
 0x3c8   : > { %1353 = vst.msk [vmem:[%s2400_s28] sm:$0xff] %vm1352_vm13, %v1350_v56 }
 0x3cd   : > { %v1362_v32 = vpop.permute.xlu1 %1361 }
 0x3ce   : > { %v1356_v59 = vpop.permute.xlu0 %1355 }
 0x3cf   : > { %1359 = vst.msk [vmem:[%s2400_s28] sm:$0xff] %vm1358_vm14, %v1356_v59 }
 0x3d0   : > { %1365 = vst.msk [vmem:[%s2400_s28] sm:$0xff] %vm1364_vm15, %v1362_v32 }
 0x3d5   : > { %v1374_v34 = vpop.permute.xlu1 %1373 }
 0x3d6   : > { %v1368_v33 = vpop.permute.xlu0 %1367 }
 0x3d7   : > { %1371 = vst.msk [vmem:[%s2400_s28] sm:$0xff] %vm1370_vm1, %v1368_v33 }
 0x3d8   : > { %1377 = vst.msk [vmem:[%s2400_s28] sm:$0xff] %vm1376_vm2, %v1374_v34 }
 0x3d9   : > { %1891 = shalt.err (!%p1888_p3)
}
 0x3da   : > { %s1892_s19 = scalar_lea.hbm %s2428_s13, 128  ;;  %s1896_s20 = scalar_lea.hbm %s2480_s6, 384 }
 0x3db   : > { %p1893_p4 = scmp.ne.s32.totalorder %s2428_s13, %s1892_s19  ;;  %p1897_p9 = scmp.lt.u32.totalorder %s2428_s13, %s2480_s6 }
 0x3dc   : > { %p1898_p10 = scmp.lt.u32.totalorder %s1896_s20, %s1892_s19  ;;  %p1900_p12 = scmp.lt.u32.totalorder %s1892_s19, %s2428_s13 }
 0x3dd   : > { %p1894_p7 = pnand %p1893_p4, %p2034_p5 }
 0x3de   : > { %p1899_p11 = por %p1898_p10, %p1897_p9 }
 0x3df   : > { %p1895_p8 = pneg %p1894_p7 }
 0x3e0   : > { %p1901_p13 = por %p1900_p12, %p1899_p11 }
 0x3e2   : > { %p1902_p0 = pnand %p1901_p13, %p1895_p8 }
 0x3e4   : > { %1905 = shalt.err (!%p1902_p0)
}
 0x3e5   : > { %1817 = dma.vmem_to_hbm [thread:$0]  (%p2034_p5), %s2430_s10, 128, %s2428_s13, %s1379_s14  }
 0x3e6 PF: > { %p1823_p1 = scmp.ge.s32.totalorder %s1940_s24, 2  ;;  %s1404_s9 = sand.u32 1, %s1928_s21  }
 0x3e7   : > { %s1405_s11 = scalar_lea.sflag [#allocation3], %s1404_s9 }
 0x3e8   : > { %p1820_p2 = pnand %p1823_p1, %p2038_p6 }
 0x3ea   : > { %1923 = dma.done.wait (!%p1820_p2), %s1405_s11, 128  }
 0x3eb   : > { %1925 = vsyncadd (!%p1820_p2), %s1405_s11, 4294967168  ;;  %p16_p3 = scmp.ge.s32.totalorder %s2021_s27, 5   ;;  %s2483_s21 = smov %s1932_s22 }
 0x3ec   : > { %s2484_s22 = smov %s1936_s23  ;;  %s2485_s23 = smov %s2032_s30 }
 0x3ed   : > { %s2486_s24 = smov %s2021_s27  ;;  %18 = sbr.rel (!%p16_p3) target bundleno = 3 (0x3), region = 79 }
 0x3f4   :  { %1410 = vsyncpa [#allocation3], 1 }
 0x3f5   :  { %1412 = vsyncpa [#allocation3 + $0x1], 1 }

</bundles_post_ra>
